<compile_context>
chip_gen: v7x
topology: tpu7x:2x2x1
jax: 0.10.0
libtpu: 0.0.40
codegen_flags: <defaults>
</compile_context>

<pallas_src>
import jax
import jax.numpy as jnp
from jax.experimental import pallas as pl
from jax.experimental.pallas import tpu as pltpu

IN_FEATURES = 100
OUT_FEATURES = 1
# ~6.25 MiB per x tile at K=100 f32; double-buffered ~12.5 MiB -> fits the
# 32 MiB scoped-VMEM limit requested below on v5e / v6e / v7x.
TB_DEFAULT = 16384


def _round_up(n, m):
    return (n + m - 1) // m * m


def linear_kernel(x_ref, w_ref, b_ref, o_ref):
    # x_ref: (tb, 100) VMEM tile, w_ref: (1, 100) resident VMEM row,
    # b_ref: (1, 1) SMEM scalar, o_ref: (tb, 1).
    prod = x_ref[...] * w_ref[...]                  # (tb, 100)  VPU
    acc = jnp.sum(prod, axis=-1, keepdims=True)     # (tb, 1)    XLU lane reduce
    o_ref[...] = acc + b_ref[0, 0]                  # scalar bias from SMEM
    # TODO(synk): if DMA ever stops dominating (e.g. native-bf16 inputs or v7x
    # HBM), switch to a lane-dense (1, tb) output slab to avoid masked stores.


def drug_model_forward(x, weight, bias, *, tb=TB_DEFAULT):
    """Forward pass of torch.nn.Linear(100, 1): y = x @ W.T + b.

    x:      (B, 100) f32
    weight: (1, 100) f32  (PyTorch layout: (out_features, in_features))
    bias:   (1,)     f32
    returns (B, 1)   f32
    """
    B, K = x.shape
    assert K == IN_FEATURES

    x = x.astype(jnp.float32)
    w_row = weight.astype(jnp.float32).reshape(OUT_FEATURES, IN_FEATURES)
    b_2d = bias.astype(jnp.float32).reshape(1, 1)
    # NOTE: no bf16 cast here — a wrapper-side cast is its own HBM pass and is
    # strictly worse than reading f32 directly. If the upstream producer
    # already emits bf16, this kernel works unchanged (f32 accumulation).

    # Batch tile: multiple of 8 sublanes, no padding / copies. Edge blocks are
    # clipped by Pallas (grid uses pl.cdiv).
    if B <= tb:
        # Keep grid >= 2 when there is enough work so both v7x TensorCores
        # get a share of the batch loop.
        tb = max(8, _round_up(pl.cdiv(B, 2), 8))
    grid = (pl.cdiv(B, tb),)

    flops = 2 * B * IN_FEATURES
    bytes_accessed = 4 * (B * IN_FEATURES          # read x
                          + IN_FEATURES + 1        # read weight + bias
                          + B * OUT_FEATURES)      # write output

    return pl.pallas_call(
        linear_kernel,
        out_shape=jax.ShapeDtypeStruct((B, OUT_FEATURES), jnp.float32),
        grid_spec=pltpu.PrefetchScalarGridSpec(
            num_scalar_prefetch=0,
            grid=grid,
            in_specs=[
                # Batch-tiled x in native (B, 100) layout: last block dim
                # equals the full array dim (no lane padding needed); Pallas
                # double-buffers the HBM->VMEM tiles.
                pl.BlockSpec((tb, IN_FEATURES), lambda i: (i, 0)),
                # Weight row: constant block, stays resident in VMEM.
                pl.BlockSpec((OUT_FEATURES, IN_FEATURES), lambda i: (0, 0)),
                # Bias: scalar in SMEM, no VMEM tile / per-step DMA.
                pl.BlockSpec(memory_space=pltpu.MemorySpace.SMEM),
            ],
            out_specs=pl.BlockSpec((tb, OUT_FEATURES), lambda i: (i, 0)),
        ),
        compiler_params=pltpu.CompilerParams(
            dimension_semantics=("parallel",),   # megacore sharding on v7x
            vmem_limit_bytes=32 * 1024 * 1024,   # v5e's scoped default is 16 MiB
        ),
        cost_estimate=pl.CostEstimate(
            flops=flops, transcendentals=0, bytes_accessed=bytes_accessed),
    )(x, w_row, b_2d)


def init_params(key):
    """Deterministic init matching torch.nn.Linear(100, 1) default init:
    U(-1/sqrt(fan_in), 1/sqrt(fan_in)) for both weight and bias.
    Weight kept in PyTorch layout (out_features, in_features) = (1, 100)."""
    kw, kb = jax.random.split(key)
    bound = 1.0 / jnp.sqrt(jnp.float32(IN_FEATURES))
    weight = jax.random.uniform(
        kw, (OUT_FEATURES, IN_FEATURES), dtype=jnp.float32,
        minval=-bound, maxval=bound)
    bias = jax.random.uniform(
        kb, (OUT_FEATURES,), dtype=jnp.float32, minval=-bound, maxval=bound)
    return weight, bias


if __name__ == "__main__":
    key = jax.random.PRNGKey(0)
    k_in, k_in2, k_in3, k_param = jax.random.split(key, 4)

    weight, bias = init_params(k_param)

    # Small batch: single grid step, block == full batch.
    batch = 8
    x = jax.random.normal(k_in, (batch, IN_FEATURES), dtype=jnp.float32)
    out = drug_model_forward(x, weight, bias)
    jax.block_until_ready(out)
    ref = x @ weight.T + bias
    assert out.shape == (batch, OUT_FEATURES)
    assert jnp.allclose(out, ref, atol=1e-5, rtol=1e-5)

    # Batch not a multiple of 8 -> exercises the clipped edge-block path
    # (grid=2 with tb=8, last block partially out of range).
    batch2 = 10
    x2 = jax.random.normal(k_in2, (batch2, IN_FEATURES), dtype=jnp.float32)
    out2 = drug_model_forward(x2, weight, bias)
    jax.block_until_ready(out2)
    ref2 = x2 @ weight.T + bias
    assert out2.shape == (batch2, OUT_FEATURES)
    assert jnp.allclose(out2, ref2, atol=1e-5, rtol=1e-5)

    # Medium batch -> exercises the grid>=2 tile-shrink path for v7x.
    batch3 = 200
    x3 = jax.random.normal(k_in3, (batch3, IN_FEATURES), dtype=jnp.float32)
    out3 = drug_model_forward(x3, weight, bias)
    jax.block_until_ready(out3)
    ref3 = x3 @ weight.T + bias
    assert out3.shape == (batch3, OUT_FEATURES)
    assert jnp.allclose(out3, ref3, atol=1e-5, rtol=1e-5)

    print("KERNEL_OK")
</pallas_src>

<mosaic_0001>
module attributes {stable_mosaic.version = 11 : i64} {
  func.func @linear_kernel(%arg0: i32, %arg1: memref<8x100xf32, #tpu.memory_space<vmem>>, %arg2: memref<1x100xf32, #tpu.memory_space<vmem>>, %arg3: memref<1x1xf32, #tpu.memory_space<smem>>, %arg4: memref<8x1xf32, #tpu.memory_space<vmem>>) attributes {dimension_semantics = [#tpu.dimension_semantics<parallel>], iteration_bounds = array<i64: 1>, scalar_prefetch = 0 : i64, scratch_operands = 0 : i64, tpu.core_type = #tpu.core_type<tc>, window_params = [{transform_indices = @transform_0, window_bounds = array<i64: 8, 100>}, {pipeline_mode = #tpu.pipeline_mode<synchronous>, transform_indices = @transform_1, window_bounds = array<i64: 1, 100>}, {transform_indices = @transform_2, window_bounds = array<i64: 1, 1>}, {transform_indices = @transform_3, window_bounds = array<i64: 8, 1>}]} {
    %c0 = arith.constant 0 : index
    %c0_0 = arith.constant 0 : index
    %0 = vector.load %arg1[%c0, %c0_0] : memref<8x100xf32, #tpu.memory_space<vmem>>, vector<8x100xf32>
    %c0_1 = arith.constant 0 : index
    %c0_2 = arith.constant 0 : index
    %1 = vector.load %arg2[%c0_1, %c0_2] : memref<1x100xf32, #tpu.memory_space<vmem>>, vector<1x100xf32>
    %2 = vector.broadcast %1 : vector<1x100xf32> to vector<8x100xf32>
    %3 = arith.mulf %0, %2 : vector<8x100xf32>
    %cst = arith.constant dense<0.000000e+00> : vector<8xf32>
    %4 = vector.multi_reduction <add>, %3, %cst [1] : vector<8x100xf32> to vector<8xf32>
    %5 = vector.shape_cast %4 : vector<8xf32> to vector<8x1xf32>
    %c0_3 = arith.constant 0 : index
    %c0_4 = arith.constant 0 : index
    %6 = memref.load %arg3[%c0_3, %c0_4] : memref<1x1xf32, #tpu.memory_space<smem>>
    %7 = vector.broadcast %6 : f32 to vector<8x1xf32>
    %8 = arith.addf %5, %7 : vector<8x1xf32>
    %c0_5 = arith.constant 0 : index
    %c0_6 = arith.constant 0 : index
    %9 = vector.load %arg4[%c0_5, %c0_6] : memref<8x1xf32, #tpu.memory_space<vmem>>, vector<8x1xf32>
    tpu.vector_store %arg4[%c0_5, %c0_6], %8 {strides = array<i32>} : memref<8x1xf32, #tpu.memory_space<vmem>>, vector<8x1xf32>,
    return
  }
  func.func @transform_0(%arg0: i32) -> (i32, i32) {
    %c0_i32 = arith.constant 0 : i32
    %c0_i32_0 = arith.constant 0 : i32
    return %arg0, %c0_i32 : i32, i32
  }
  func.func @transform_1(%arg0: i32) -> (i32, i32) {
    %c0_i32 = arith.constant 0 : i32
    %c0_i32_0 = arith.constant 0 : i32
    %c0_i32_1 = arith.constant 0 : i32
    return %c0_i32, %c0_i32_0 : i32, i32
  }
  func.func @transform_2(%arg0: i32) -> (i32, i32) {
    %c0_i32 = arith.constant 0 : i32
    %c0_i32_0 = arith.constant 0 : i32
    %c0_i32_1 = arith.constant 0 : i32
    return %c0_i32, %c0_i32_0 : i32, i32
  }
  func.func @transform_3(%arg0: i32) -> (i32, i32) {
    %c0_i32 = arith.constant 0 : i32
    %c0_i32_0 = arith.constant 0 : i32
    return %arg0, %c0_i32 : i32, i32
  }
}

</mosaic_0001>

<bundles_post_ra>
// kernel: tpu_custom_call.1
= control target key start
LH: loop header
LB: loop body
LE: loop exit
PB: predicated region body
PF: predicated region fallthrough
CT: control target
= control target key end

     0   :  { %9 = vsyncpa [#allocation4], 0  ;;  %s76_s12 = smov [#allocation3]   ;;  %s118_s0 = inlined_call_operand.hbm [shape: f32[8,100], index: 0, kind: input, shape index: {}]   ;;  %s119_s1 = inlined_call_operand.vmem [shape: f32[1,100], index: 1, kind: input, shape index: {}]   ;;  %s120_s2 = inlined_call_operand.<no memory space> [shape: f32[1,1], index: 2, kind: input, shape index: {}]   ;;  %s121_s3 = inlined_call_operand.vmem [shape: f32[8,1], index: 3, kind: output, shape index: {}]  }
   0x1   :  { %s16_s13 = sshll.u32 %s76_s12, 4  ;;  %s52_s16 = scalar_lea.hbm %s118_s0, 128  ;;  %s17_s13 = int_to_ptr.vmem [resolvable:$true] %s16_s13 }
   0x2   :  { %p53_p0 = scmp.ne.s32.totalorder %s118_s0, %s52_s16  ;;  %p56_p1 = scmp.lt.u32.totalorder %s52_s16, %s118_s0 }
   0x4   :  { %p58_p2 = pnand %p56_p1, %p53_p0 }
   0x6   :  { %61 = shalt.err (!%p58_p2)
}
   0x7   :  { %s62_s21 = scalar_lea.vmem %s17_s13, 128  ;;  %p67_p4 = scmp.lt.s32.totalorder %s17_s13, %s17_s13 }
   0x8   :  { %p63_p3 = scmp.ne.s32.totalorder %s17_s13, %s62_s21  ;;  %p68_p5 = scmp.lt.s32.totalorder %s62_s21, %s62_s21 }
   0xa   :  { %p69_p6 = por %p68_p5, %p67_p4 }
   0xc   :  { %p70_p7 = pnand %p69_p6, %p63_p3 }
   0xe   :  { %73 = shalt.err (!%p70_p7)
}
   0xf   :  { %19 = dma.hbm_to_vmem [thread:$0]  %s118_s0, 128, %s17_s13, [#allocation4]  }
  0x10   :  { %74 = dma.done.wait [#allocation4], 128  }
  0x11   :  { %75 = vsyncadd [#allocation4], 4294967168  ;;  %v27_v0 = vld [vmem:[#allocation3] sm:$0xff]  ;;  %vm36_vm0 = vcmask 818176   ;;  %v41_v4 = vstv %s120_s2  ;;  %vm43_vm1 = vcmask 7168  }
  0x12   :  { %v50_v1 = vld [vmem:[%s119_s1] ss:$0 sm:$0xff] }
  0x13   :  { %v35_v2 = vmul.f32 %v50_v1, %v27_v0 }
  0x15   :  { %v37_v3 = vsel %vm36_vm0, %v35_v2, 0.0 }
  0x16   :  { %38 = vadd.xlane.f32.xlu0 %v37_v3 }
  0xa3   :  { %v39_v5 = vpop.xlane.xlu0 %38 }
  0xa4   :  { %v42_v6 = vadd.f32 %v41_v4, %v39_v5 }
  0xa6   :  { %44 = vst.msk [vmem:[%s121_s3] sm:$0xff] %vm43_vm1, %v42_v6 }
  0xa7   :  { %49 = vsyncpa [#allocation4], 1 }

</bundles_post_ra>
